<compile_context>
chip_gen: v6e
topology: v6e:2x2x1
jax: 0.10.0
libtpu: 0.0.40
codegen_flags: <defaults>
</compile_context>

<pallas_src>
import functools

import jax
import jax.numpy as jnp
from jax.experimental import pallas as pl
from jax.experimental.pallas import tpu as pltpu


def _gru_recurrence_kernel(gx_ref, whh_ref, bhh_ref, hout_ref, h_scr,
                           *, seq_len, tile_t):
    """Serial GRU recurrence over one coarse time tile.

    gx_ref : (tile_t, batch, 3*hid) f32  precomputed x_t @ W_ih + b_ih (gates r,z,n)
    whh_ref: (hid, 3*hid)                fused recurrent weights (r,z,n stacked on lanes)
    bhh_ref: (1, 3*hid) f32
    hout_ref: (batch, hid)               final hidden state
    h_scr  : (batch, hid) f32            hidden state carried across time tiles
    """
    i = pl.program_id(0)
    hid = whh_ref.shape[0]

    @pl.when(i == 0)
    def _():
        h_scr[...] = jnp.zeros_like(h_scr)

    # Loaded once per tile; stay in vregs for the whole inner loop.
    w_hh = whh_ref[...]
    b_hh = bhh_ref[...]

    # Number of valid steps in this tile (last tile may be ragged).
    steps = jnp.minimum(tile_t, seq_len - i * tile_t)

    def step(t, h_prev):
        # Single fused MXU matmul per step: (batch, hid) x (hid, 3*hid),
        # f32 accumulation regardless of weight dtype.
        gh = jnp.dot(h_prev.astype(w_hh.dtype), w_hh,
                     preferred_element_type=jnp.float32) + b_hh
        gx_t = gx_ref[t]                                    # (batch, 3*hid), f32
        # Gate order follows PyTorch: r, z, n.
        r = jax.nn.sigmoid(gx_t[:, 0 * hid:1 * hid] + gh[:, 0 * hid:1 * hid])
        z = jax.nn.sigmoid(gx_t[:, 1 * hid:2 * hid] + gh[:, 1 * hid:2 * hid])
        n = jnp.tanh(gx_t[:, 2 * hid:3 * hid] + r * gh[:, 2 * hid:3 * hid])
        return (1.0 - z) * n + z * h_prev

    h_new = jax.lax.fori_loop(0, steps, step, h_scr[...])
    h_scr[...] = h_new
    # Output block index is constant across the grid, so the block stays
    # resident in VMEM; writing every tile (not just the last) avoids a branch.
    hout_ref[...] = h_new.astype(hout_ref.dtype)


def gru_encoder_pallas(x_btf, w_ih, w_hh, b_ih, b_hh, *,
                       param_dtype=jnp.float32, time_tile=256):
    """Forward pass of Encoder (single-layer nn.GRU, h0 = 0).

    x_btf: [batch, seq, feat]   batch-first input (as given to Encoder.forward)
    w_ih : [3*hid, feat]        PyTorch nn.GRU weight_ih_l0 (gates r, z, n)
    w_hh : [3*hid, hid]         PyTorch nn.GRU weight_hh_l0
    b_ih : [3*hid]              PyTorch nn.GRU bias_ih_l0
    b_hh : [3*hid]              PyTorch nn.GRU bias_hh_l0
    Returns enc_hidden: [1, batch, hid]  (matches nn.GRU hidden output).
    """
    batch, seq, feat = x_btf.shape
    hid = w_hh.shape[1]

    # --- Hoisted, non-recurrent input projection: one dense XLA matmul. ---
    # 'btf,fg->tbg' folds the time-major reordering into the dot itself.
    w_ih_t = jnp.transpose(w_ih).astype(jnp.float32)        # (feat, 3*hid)
    gx = jnp.einsum('btf,fg->tbg', x_btf.astype(jnp.float32), w_ih_t)
    gx = gx + b_ih.astype(jnp.float32)[None, None, :]       # (seq, batch, 3*hid)

    # Gate-fused recurrent weights (bf16 recommended on v6e/v7x for large hid).
    w_hh_t = jnp.transpose(w_hh).astype(param_dtype)        # (hid, 3*hid)
    b_hh_2d = b_hh.astype(jnp.float32).reshape(1, 3 * hid)

    tile_t = min(seq, time_tile)
    num_tiles = pl.cdiv(seq, tile_t)

    kernel = functools.partial(_gru_recurrence_kernel, seq_len=seq, tile_t=tile_t)

    h_final = pl.pallas_call(
        kernel,
        out_shape=jax.ShapeDtypeStruct((batch, hid), x_btf.dtype),
        grid_spec=pltpu.PrefetchScalarGridSpec(
            num_scalar_prefetch=0,
            grid=(num_tiles,),
            in_specs=[
                # Coarse time tile of the precomputed input gates.
                pl.BlockSpec((tile_t, batch, 3 * hid), lambda i: (i, 0, 0)),
                # Constant block index -> DMA'd once, stays VMEM-resident.
                pl.BlockSpec((hid, 3 * hid), lambda i: (0, 0)),
                pl.BlockSpec((1, 3 * hid), lambda i: (0, 0)),
            ],
            out_specs=pl.BlockSpec((batch, hid), lambda i: (0, 0)),
            scratch_shapes=[pltpu.VMEM((batch, hid), jnp.float32)],
        ),
        compiler_params=pltpu.CompilerParams(
            dimension_semantics=("arbitrary",),   # time recurrence is serial
        ),
    )(gx, w_hh_t, b_hh_2d)

    return h_final[None, :, :]                   # [1, batch, hid]


def _gru_reference(x_btf, w_ih, w_hh, b_ih, b_hh):
    """Pure-JAX reference mirroring torch.nn.GRU (PyTorch weight layout)."""
    x_tbf = jnp.transpose(x_btf, (1, 0, 2)).astype(jnp.float32)
    batch = x_btf.shape[0]
    hid = w_hh.shape[1]

    W_ir, W_iz, W_in = w_ih[:hid], w_ih[hid:2 * hid], w_ih[2 * hid:]
    W_hr, W_hz, W_hn = w_hh[:hid], w_hh[hid:2 * hid], w_hh[2 * hid:]
    b_ir, b_iz, b_in = b_ih[:hid], b_ih[hid:2 * hid], b_ih[2 * hid:]
    b_hr, b_hz, b_hn = b_hh[:hid], b_hh[hid:2 * hid], b_hh[2 * hid:]

    def step(h, x_t):
        r = jax.nn.sigmoid(x_t @ W_ir.T + b_ir + h @ W_hr.T + b_hr)
        z = jax.nn.sigmoid(x_t @ W_iz.T + b_iz + h @ W_hz.T + b_hz)
        n = jnp.tanh(x_t @ W_in.T + b_in + r * (h @ W_hn.T + b_hn))
        h_new = (1.0 - z) * n + z * h
        return h_new, None

    h0 = jnp.zeros((batch, hid), jnp.float32)
    h_final, _ = jax.lax.scan(step, h0, x_tbf)
    return h_final[None, :, :].astype(x_btf.dtype)


if __name__ == "__main__":
    # Small shapes consistent with Encoder.forward: [batch, N-action, n_feature]
    batch, seq, feat, hid = 2, 8, 4, 32

    key = jax.random.PRNGKey(0)
    kx, kwi, kwh, kbi, kbh = jax.random.split(key, 5)

    # PyTorch-default-like init: uniform in +-1/sqrt(hid), PyTorch weight layout.
    bound = 1.0 / jnp.sqrt(jnp.float32(hid))
    x = jax.random.normal(kx, (batch, seq, feat), dtype=jnp.float32)
    w_ih = jax.random.uniform(kwi, (3 * hid, feat), jnp.float32, -bound, bound)
    w_hh = jax.random.uniform(kwh, (3 * hid, hid), jnp.float32, -bound, bound)
    b_ih = jax.random.uniform(kbi, (3 * hid,), jnp.float32, -bound, bound)
    b_hh = jax.random.uniform(kbh, (3 * hid,), jnp.float32, -bound, bound)

    enc_hidden = gru_encoder_pallas(x, w_ih, w_hh, b_ih, b_hh)
    enc_hidden = jax.block_until_ready(enc_hidden)

    ref = _gru_reference(x, w_ih, w_hh, b_ih, b_hh)
    assert enc_hidden.shape == (1, batch, hid), enc_hidden.shape
    assert jnp.allclose(enc_hidden, ref, atol=1e-5, rtol=1e-4), "mismatch vs reference"

    print("KERNEL_OK")
</pallas_src>

<mosaic_0001>
module attributes {stable_mosaic.version = 11 : i64} {
  func.func @_gru_recurrence_kernel(%arg0: i32, %arg1: memref<8x2x96xf32, #tpu.memory_space<vmem>>, %arg2: memref<32x96xf32, #tpu.memory_space<vmem>>, %arg3: memref<1x96xf32, #tpu.memory_space<vmem>>, %arg4: memref<2x32xf32, #tpu.memory_space<vmem>>, %arg5: memref<2x32xf32, #tpu.memory_space<vmem>>) attributes {dimension_semantics = [#tpu.dimension_semantics<arbitrary>], iteration_bounds = array<i64: 1>, scalar_prefetch = 0 : i64, scratch_operands = 1 : i64, tpu.core_type = #tpu.core_type<tc>, window_params = [{transform_indices = @transform_0, window_bounds = array<i64: 8, 2, 96>}, {pipeline_mode = #tpu.pipeline_mode<synchronous>, transform_indices = @transform_1, window_bounds = array<i64: 32, 96>}, {pipeline_mode = #tpu.pipeline_mode<synchronous>, transform_indices = @transform_2, window_bounds = array<i64: 1, 96>}, {pipeline_mode = #tpu.pipeline_mode<synchronous>, transform_indices = @transform_3, window_bounds = array<i64: 2, 32>}]} {
    %c0_i32 = arith.constant 0 : i32
    %0 = arith.cmpi eq, %arg0, %c0_i32 : i32
    %1 = arith.extui %0 : i1 to i32
    %c0_i32_0 = arith.constant 0 : i32
    %2 = arith.cmpi ne, %1, %c0_i32_0 : i32
    scf.if %2 {
      %cst = arith.constant 0.000000e+00 : f32
      %14 = vector.broadcast %cst : f32 to vector<2x32xf32>
      %c0_13 = arith.constant 0 : index
      %c0_14 = arith.constant 0 : index
      %15 = vector.load %arg5[%c0_13, %c0_14] : memref<2x32xf32, #tpu.memory_space<vmem>>, vector<2x32xf32>
      tpu.vector_store %arg5[%c0_13, %c0_14], %14 {strides = array<i32>} : memref<2x32xf32, #tpu.memory_space<vmem>>, vector<2x32xf32>,
    } else {
    }
    %c0 = arith.constant 0 : index
    %c0_1 = arith.constant 0 : index
    %3 = vector.load %arg2[%c0, %c0_1] : memref<32x96xf32, #tpu.memory_space<vmem>>, vector<32x96xf32>
    %c0_2 = arith.constant 0 : index
    %c0_3 = arith.constant 0 : index
    %4 = vector.load %arg3[%c0_2, %c0_3] : memref<1x96xf32, #tpu.memory_space<vmem>>, vector<1x96xf32>
    %c8_i32 = arith.constant 8 : i32
    %5 = arith.muli %arg0, %c8_i32 : i32
    %c8_i32_4 = arith.constant 8 : i32
    %6 = arith.subi %c8_i32_4, %5 : i32
    %c8_i32_5 = arith.constant 8 : i32
    %7 = arith.minsi %c8_i32_5, %6 : i32
    %c0_6 = arith.constant 0 : index
    %c0_7 = arith.constant 0 : index
    %8 = vector.load %arg5[%c0_6, %c0_7] : memref<2x32xf32, #tpu.memory_space<vmem>>, vector<2x32xf32>
    %c0_i32_8 = arith.constant 0 : i32
    %9 = arith.subi %7, %c0_i32_8 : i32
    %10 = arith.addi %c0_i32_8, %9 : i32
    %c1_i32 = arith.constant 1 : i32
    %11 = scf.for %arg6 = %c0_i32_8 to %10 step %c1_i32 iter_args(%arg7 = %8) -> (vector<2x32xf32>)  : i32 {
      %cst = arith.constant dense<0.000000e+00> : vector<2x96xf32>
      %14 = tpu.matmul %arg7, %3, %cst {dimension_numbers = #tpu.dot_dimension_numbers<[1], [0], [0], [1], [0, 0, 1, 1], [], []>} : vector<2x32xf32>, vector<32x96xf32>, vector<2x96xf32> -> vector<2x96xf32>
      %15 = vector.broadcast %4 : vector<1x96xf32> to vector<2x96xf32>
      %16 = arith.addf %14, %15 : vector<2x96xf32>
      %17 = arith.index_cast %arg6 : i32 to index
      %c0_13 = arith.constant 0 : index
      %c0_14 = arith.constant 0 : index
      %18 = vector.load %arg1[%17, %c0_13, %c0_14] : memref<8x2x96xf32, #tpu.memory_space<vmem>>, vector<1x2x96xf32>
      %19 = vector.shape_cast %18 : vector<1x2x96xf32> to vector<2x96xf32>
      %20 = vector.extract_strided_slice %19 {offsets = [0, 0], sizes = [2, 32], strides = [1, 1]} : vector<2x96xf32> to vector<2x32xf32>
      %21 = vector.extract_strided_slice %16 {offsets = [0, 0], sizes = [2, 32], strides = [1, 1]} : vector<2x96xf32> to vector<2x32xf32>
      %22 = arith.addf %20, %21 : vector<2x32xf32>
      %23 = arith.negf %22 : vector<2x32xf32>
      %24 = math.exp %23 : vector<2x32xf32>
      %cst_15 = arith.constant 1.000000e+00 : f32
      %25 = vector.broadcast %cst_15 : f32 to vector<2x32xf32>
      %26 = arith.addf %25, %24 : vector<2x32xf32>
      %27 = arith.divf %25, %26 : vector<2x32xf32>
      %28 = vector.extract_strided_slice %19 {offsets = [0, 32], sizes = [2, 32], strides = [1, 1]} : vector<2x96xf32> to vector<2x32xf32>
      %29 = vector.extract_strided_slice %16 {offsets = [0, 32], sizes = [2, 32], strides = [1, 1]} : vector<2x96xf32> to vector<2x32xf32>
      %30 = arith.addf %28, %29 : vector<2x32xf32>
      %31 = arith.negf %30 : vector<2x32xf32>
      %32 = math.exp %31 : vector<2x32xf32>
      %cst_16 = arith.constant 1.000000e+00 : f32
      %33 = vector.broadcast %cst_16 : f32 to vector<2x32xf32>
      %34 = arith.addf %33, %32 : vector<2x32xf32>
      %35 = arith.divf %33, %34 : vector<2x32xf32>
      %36 = vector.extract_strided_slice %19 {offsets = [0, 64], sizes = [2, 32], strides = [1, 1]} : vector<2x96xf32> to vector<2x32xf32>
      %37 = vector.extract_strided_slice %16 {offsets = [0, 64], sizes = [2, 32], strides = [1, 1]} : vector<2x96xf32> to vector<2x32xf32>
      %38 = arith.mulf %27, %37 : vector<2x32xf32>
      %39 = arith.addf %36, %38 : vector<2x32xf32>
      %40 = math.tanh %39 : vector<2x32xf32>
      %cst_17 = arith.constant 1.000000e+00 : f32
      %41 = vector.broadcast %cst_17 : f32 to vector<2x32xf32>
      %42 = arith.subf %41, %35 : vector<2x32xf32>
      %43 = arith.mulf %42, %40 : vector<2x32xf32>
      %44 = arith.mulf %35, %arg7 : vector<2x32xf32>
      %45 = arith.addf %43, %44 : vector<2x32xf32>
      scf.yield %45 : vector<2x32xf32>
    }
    %c0_9 = arith.constant 0 : index
    %c0_10 = arith.constant 0 : index
    %12 = vector.load %arg5[%c0_9, %c0_10] : memref<2x32xf32, #tpu.memory_space<vmem>>, vector<2x32xf32>
    tpu.vector_store %arg5[%c0_9, %c0_10], %11 {strides = array<i32>} : memref<2x32xf32, #tpu.memory_space<vmem>>, vector<2x32xf32>,
    %c0_11 = arith.constant 0 : index
    %c0_12 = arith.constant 0 : index
    %13 = vector.load %arg4[%c0_11, %c0_12] : memref<2x32xf32, #tpu.memory_space<vmem>>, vector<2x32xf32>
    tpu.vector_store %arg4[%c0_11, %c0_12], %11 {strides = array<i32>} : memref<2x32xf32, #tpu.memory_space<vmem>>, vector<2x32xf32>,
    return
  }
  func.func @transform_0(%arg0: i32) -> (i32, i32, i32) {
    %c0_i32 = arith.constant 0 : i32
    %c0_i32_0 = arith.constant 0 : i32
    %c0_i32_1 = arith.constant 0 : i32
    return %arg0, %c0_i32, %c0_i32_0 : i32, i32, i32
  }
  func.func @transform_1(%arg0: i32) -> (i32, i32) {
    %c0_i32 = arith.constant 0 : i32
    %c0_i32_0 = arith.constant 0 : i32
    %c0_i32_1 = arith.constant 0 : i32
    return %c0_i32, %c0_i32_0 : i32, i32
  }
  func.func @transform_2(%arg0: i32) -> (i32, i32) {
    %c0_i32 = arith.constant 0 : i32
    %c0_i32_0 = arith.constant 0 : i32
    %c0_i32_1 = arith.constant 0 : i32
    return %c0_i32, %c0_i32_0 : i32, i32
  }
  func.func @transform_3(%arg0: i32) -> (i32, i32) {
    %c0_i32 = arith.constant 0 : i32
    %c0_i32_0 = arith.constant 0 : i32
    %c0_i32_1 = arith.constant 0 : i32
    return %c0_i32, %c0_i32_0 : i32, i32
  }
}

</mosaic_0001>

<bundles_post_ra>
// kernel: tpu_custom_call.1
= control target key start
LH: loop header
LB: loop body
LE: loop exit
PB: predicated region body
PF: predicated region fallthrough
CT: control target
= control target key end

     0   :  { %8 = vsyncpa [#allocation4], 0  ;;  %s414_s0 = inlined_call_operand.hbm [shape: f32[8,2,96], index: 0, kind: input, shape index: {}]   ;;  %s415_s1 = inlined_call_operand.hbm [shape: f32[32,96], index: 1, kind: input, shape index: {}]   ;;  %s416_s2 = inlined_call_operand.vmem [shape: f32[1,96], index: 2, kind: input, shape index: {}]   ;;  %s417_s3 = inlined_call_operand.hbm [shape: f32[2,32], index: 3, kind: output, shape index: {}]  }
   0x1   :  { %9 = vsyncpa [#allocation7], 0 }
   0x2   :  { %10 = vsyncpa [#allocation5], 0  ;;  %s348_s12 = smov [#allocation3]  }
   0x3   :  { %s16_s13 = sshll.u32 %s348_s12, 4  ;;  %s17_s13 = int_to_ptr.vmem [resolvable:$true] %s16_s13 }
   0x4   :  { %s274_s14 = scalar_lea.vmem %s17_s13, 256  ;;  %p279_p1 = scmp.lt.s32.totalorder %s17_s13, %s17_s13 }
   0x5   :  { %p275_p0 = scmp.ne.s32.totalorder %s17_s13, %s274_s14  ;;  %p280_p2 = scmp.lt.s32.totalorder %s274_s14, %s274_s14 }
   0x7   :  { %p281_p3 = por %p280_p2, %p279_p1 }
   0x9   :  { %p282_p4 = pnand %p281_p3, %p275_p0 }
   0xb   :  { %285 = shalt.err (!%p282_p4)
}
   0xc   :  { %s349_s15 = smov 32   ;;  %s350_s16 = smov 2  }
   0xd   :  { %22 = dma.hbm_to_vmem [thread:$0]  %s414_s0, 256, %s17_s13, [#allocation4], %s349_s15, %s349_s15, %s350_s16  }
   0xe   :  { %s351_s19 = smov [#allocation6]  }
   0xf   :  { %s28_s20 = sshll.u32 %s351_s19, 4  ;;  %s29_s20 = int_to_ptr.vmem [resolvable:$true] %s28_s20 }
  0x10   :  { %s294_s21 = scalar_lea.vmem %s29_s20, 512  ;;  %p299_p6 = scmp.lt.s32.totalorder %s29_s20, %s29_s20 }
  0x11   :  { %p295_p5 = scmp.ne.s32.totalorder %s29_s20, %s294_s21  ;;  %p300_p7 = scmp.lt.s32.totalorder %s294_s21, %s294_s21 }
  0x13   :  { %p301_p8 = por %p300_p7, %p299_p6 }
  0x15   :  { %p302_p9 = pnand %p301_p8, %p295_p5 }
  0x17   :  { %305 = shalt.err (!%p302_p9)
}
  0x18   :  { %s352_s22 = smov 128   ;;  %s353_s23 = smov 8  }
  0x19   :  { %34 = dma.hbm_to_vmem [thread:$0]  %s415_s1, 512, %s29_s20, [#allocation7], %s352_s22, %s352_s22, %s353_s23  }
  0x1a   :  { %334 = dma.done.wait [#allocation4], 256  }
  0x1b   :  { %335 = vsyncadd [#allocation4], 4294967040 }
  0x1c   :  { %336 = dma.done.wait [#allocation7], 512  }
  0x1d   :  { %337 = vsyncadd [#allocation7], 4294966784  ;;  %vm47_vm0 = vcmask 254976   ;;  %v354_v0 = vmov 0.0   ;;  %v388_v1 = vld [vmem:[#allocation6] sm:$0xff]  ;;  %v390_v2 = vld [vmem:[#allocation6 + $0x8] sm:$0xff] }
  0x1e   :  { %48 = vst.msk [vmem:[#allocation2] sm:$0x3] %vm47_vm0, %v354_v0  ;;  %v392_v3 = vld [vmem:[#allocation6 + $0x10] sm:$0xff]  ;;  %v52_v4 = vld [vmem:[#allocation6 + $0x18] sm:$0xff]  ;;  %v211_v5 = vld [vmem:[%s416_s2] ss:$0 sm:$0xff] }
  0x1f   :  { %s397_s1 = smov 0  }
  0x25   :  { %v58_v6 = vld [vmem:[#allocation2] sm:$0x3]  }
  0x26   :  { %v340_v7 = vmov %v58_v6  }
  0x27 LB: > { %v355_v8 = vmov 0.0   ;;  %vm356_vm1 = vmmov 0   ;;  %vm72_vm2 = vcmask 261120   ;;  %s357_s2 = smov 64   ;;  %s213_s27 = sshll.u32 %s346_s1, 1  ;;  %s346_s1 = sphi %s397_s1, %s62_s1   ;;  %v342_v7 = vphi %v340_v7, %v341_v7  }
  0x28   : > { %220 = vmatprep.subr.mxu0 %v355_v8  ;;  %228 = vmatprep.mubr.msk.f32.mxu0 %vm356_vm1, %v355_v8  ;;  %s147_s28 = scalar_lea.vmem [#allocation3], %s213_s27  ;;  %s358_s29 = smov 96  }
  0x29   : > { %221 = vmatpush3.msra.mxu0 %v52_v4  ;;  %v148_v12 = vld [vmem:[%s147_s28] sm:$0x3]  ;;  %s359_s30 = smov 32   ;;  %s62_s1 = sadd.s32 1, %s346_s1  }
  0x2a   : > { %222 = vmatprep.subr.mxu0 %v355_v8  ;;  %p61_p10 = scmp.ge.s32.totalorder %s62_s1, 8 }
  0x2b   : > { %223 = vmatpush3.msra.mxu0 %v392_v3  ;;  %s360_s4 = smov (%p61_p10), [#allocation8]  }
  0x2c   : > { %224 = vmatprep.subr.mxu0 %v355_v8  ;;  %s191_s5 = sshll.u32 (%p61_p10), %s360_s4, 4  ;;  %s192_s5 = int_to_ptr.vmem [resolvable:$true] %s191_s5 }
  0x2d   : > { %225 = vmatpush3.msra.mxu0 %v390_v2  ;;  %s306_s6 = scalar_lea.vmem (%p61_p10), %s192_s5, 32  ;;  %p311_p12 = scmp.lt.s32.totalorder (%p61_p10), %s192_s5, %s192_s5 }
  0x2e   : > { %226 = vmatprep.subr.mxu0 %v355_v8  ;;  %p307_p11 = scmp.ne.s32.totalorder (%p61_p10), %s192_s5, %s306_s6  ;;  %p312_p13 = scmp.lt.s32.totalorder (%p61_p10), %s306_s6, %s306_s6 }
  0x2f   : > { %227 = vmatpush3.msra.mxu0 %v388_v1 }
  0x30   : > { %229 = vmatmul.mubr.msk.f32.vlgmr.msra.gmra.mxu0 %vm72_vm2, %v342_v7  ;;  %p313_p0 = por (%p61_p10), %p312_p13, %p311_p12 }
  0x32   :  { %p314_p1 = pnand (%p61_p10), %p313_p0, %p307_p11 }
  0xf0   : > { %v142_v9 = vpop.f32.mrf.mxu0 }
  0xf1   : > { %v143_v10 = vadd.f32 %v211_v5, %v142_v9 }
  0xf2   : > { %v230_v11 = vpop.f32.mrf.mxu0 }
  0xf3   : > { %157 = vrot.lane.b32.xlu0 %v143_v10, %s357_s2  ;;  %v149_v13 = vadd.f32 %v148_v12, %v143_v10 }
  0xf5   : > { %v214_v14 = vmul.f32 -1.442695, %v149_v13 }
  0xf7   : > { %260 = vpow2.f32 %v214_v14 }
 0x104   : > { %v261_v15 = vpop.eup %260 }
 0x105   : > { %v153_v16 = vadd.f32 1.0, %v261_v15 }
 0x107   : > { %262 = vrcp.f32 %v153_v16 }
 0x114   : > { %v263_v17 = vpop.eup %262 }
 0x115   : > { %v167_v24 = vsub.f32 1.0, %v263_v17 }
 0x165   : > { %v158_v18 = vpop.permute.xlu0 %157 }
 0x166   : > { %v160_v19 = vmul.f32 %v263_v17, %v158_v18 }
 0x168   : > { %162 = vrot.lane.b32.xlu0 %v160_v19, %s357_s2 }
 0x1da   : > { %v163_v20 = vpop.permute.xlu0 %162 }
 0x1db   : > { %v165_v21 = vadd.f32 %v163_v20, %v148_v12 }
 0x1dd   : > { %264 = vtanh.f32 %v165_v21 }
 0x1ea   : > { %v265_v22 = vpop.eup %264 }
 0x1eb   : > { %169 = vrot.lane.b32.xlu1 %v265_v22, %s358_s29 }
 0x1ef   : > { %173 = vrot.lane.b32.xlu1 %v342_v7, %s359_s30 }
 0x25d   : > { %v170_v23 = vpop.permute.xlu1 %169 }
 0x25e   : > { %v172_v26 = vmul.f32 %v170_v23, %v167_v24 }
 0x261   : > { %v174_v25 = vpop.permute.xlu1 %173 }
 0x262   : > { %v176_v27 = vmul.f32 %v263_v17, %v174_v25 }
 0x264   : > { %v177_v28 = vadd.f32 %v176_v27, %v172_v26 }
 0x266   : > { %179 = vrot.lane.b32.xlu0 %v177_v28, %s358_s29 }
 0x2d5   :  { %64 = sbr.rel (!%p61_p10) target bundleno = 39 (0x27), region = 52 }
 0x2d8   : > { %v180_v29 = vpop.permute.xlu0 %179  }
 0x2d9   : > { %v341_v7 = vmov %v180_v29   ;;  %184 = vst.msk [vmem:[#allocation8] sm:$0x3] (%p61_p10), %vm47_vm0, %v180_v29  ;;  %183 = vst.msk [vmem:[#allocation2] sm:$0x3] (%p61_p10), %vm47_vm0, %v180_v29 }
 0x2da   :  { %317 = shalt.err (!%p314_p1)
}
 0x2db   :  { %194 = dma.vmem_to_hbm [thread:$0]  %s192_s5, 32, %s417_s3, [#allocation5]  }
 0x2dc   :  { %338 = dma.done.wait [#allocation5], 32  }
 0x2dd   :  { %339 = vsyncadd [#allocation5], 4294967264 }
 0x2de   :  { %198 = vsyncpa [#allocation4], 1 }
 0x2df   :  { %199 = vsyncpa [#allocation7], 1 }
 0x2e0   :  { %200 = vsyncpa [#allocation5], 1 }

</bundles_post_ra>
